<compile_context>
chip_gen: v6e
topology: v6e:2x2x1
jax: 0.10.0
libtpu: 0.0.40
codegen_flags: <defaults>
</compile_context>

<pallas_src>
import functools

import jax
import jax.numpy as jnp
from jax.experimental import pallas as pl
from jax.experimental.pallas import tpu as pltpu


def _has_bf16_eup():
    # bf16 EUP exists on v6e / v7x; v2-v5e do not.  Perf-only decision, never
    # affects correctness, so a conservative fallback is fine.
    try:
        kind = jax.devices()[0].device_kind.lower()
    except Exception:
        return False
    return not any(tag in kind for tag in ("v2", "v3", "v4", "v5"))


def _window_attention_kernel(x_ref, wqkv_ref, bqkv_ref, wp_ref, bp_ref, o_ref,
                             *, num_heads, exp_dtype):
    # x_ref:    (TB, N, C)  bf16   block of windows (pos-emb already added)
    # wqkv_ref: (C, 3C)     bf16   fused QKV weight (q columns pre-scaled)
    # bqkv_ref: (1, 3C)     f32    fused QKV bias   (q part pre-scaled)
    # wp_ref:   (C, C)      bf16   output projection weight
    # bp_ref:   (1, C)      f32    output projection bias
    # o_ref:    (TB, N, C)  bf16
    TB, N, C = x_ref.shape
    H = num_heads
    D = C // H

    xin = x_ref[...].reshape(TB * N, C)                       # bf16, (TB*N, C)

    # One wide QKV GEMM over all TB windows (M = TB*N rows, 3C-wide output).
    qkv = jnp.dot(xin, wqkv_ref[...],
                  preferred_element_type=jnp.float32) + bqkv_ref[...]  # (TB*N, 3C) f32

    ctx_heads = []
    for h in range(H):  # H is small (4); static unroll
        # Per-head lane slices of the fused QKV result (cheap; XLU slot).
        q = qkv[:, 0 * C + h * D:0 * C + (h + 1) * D]
        k = qkv[:, 1 * C + h * D:1 * C + (h + 1) * D]
        v = qkv[:, 2 * C + h * D:2 * C + (h + 1) * D]
        q = q.reshape(TB, N, D).astype(jnp.bfloat16)
        k = k.reshape(TB, N, D).astype(jnp.bfloat16)
        v = v.reshape(TB, N, D).astype(jnp.bfloat16)

        # Scores, batched over windows (leading batch dim -> no transposes).
        s = jnp.einsum('bqd,bkd->bqk', q, k,
                       preferred_element_type=jnp.float32)    # (TB, N, N) f32

        # Numerically stable softmax: max/sum/reciprocal in f32; exp in
        # bf16 on chips with a bf16 EUP (exp_dtype), f32 otherwise.
        s = s - jnp.max(s, axis=-1, keepdims=True)
        p = jnp.exp(s.astype(exp_dtype)).astype(jnp.float32)
        denom = jnp.sum(p, axis=-1, keepdims=True)
        p = (p * pl.reciprocal(denom, approx=True)).astype(jnp.bfloat16)

        # Context for this head: (TB, N, D) -> (TB*N, D) bf16.
        ch = jnp.einsum('bqk,bkd->bqd', p, v,
                        preferred_element_type=jnp.float32)
        ctx_heads.append(ch.reshape(TB * N, D).astype(jnp.bfloat16))

    # Lane-concat heads and run one full-width projection GEMM (K = C).
    ctx = jnp.concatenate(ctx_heads, axis=-1)                 # (TB*N, C) bf16
    out = jnp.dot(ctx, wp_ref[...],
                  preferred_element_type=jnp.float32) + bp_ref[...]

    o_ref[...] = out.reshape(TB, N, C).astype(o_ref.dtype)


def window_attention(x, pos_emb, w_qkv, b_qkv, w_proj, b_proj, *,
                     num_heads, block_windows=128, bf16_exp=None):
    """x: (B_, N, C) float32. Linear weights stored as (in, out).
    Returns the attention output in bfloat16 (model activation dtype)."""
    B_, N, C = x.shape
    H = num_heads
    D = C // H
    scale = D ** (-0.5)

    if bf16_exp is None:
        bf16_exp = _has_bf16_eup()
    exp_dtype = jnp.bfloat16 if bf16_exp else jnp.float32

    # ---- wrapper-side (free, one-time) weight prep -------------------------
    # QKV columns are [q | k | v], each head-major (H, D).  Fold the q scale
    # into the q columns / bias so the kernel never multiplies by `scale`.
    wqkv = w_qkv.astype(jnp.float32)
    wqkv = wqkv.at[:, :C].multiply(scale)
    bqkv = b_qkv.reshape(1, 3 * C).astype(jnp.float32)
    bqkv = bqkv.at[:, :C].multiply(scale)

    wqkv = wqkv.astype(jnp.bfloat16)
    wp = w_proj.astype(jnp.bfloat16)
    bp = b_proj.reshape(1, C).astype(jnp.float32)

    # Position add folded into the f32->bf16 cast (no extra HBM pass).
    x_bf = (x + pos_emb).astype(jnp.bfloat16)

    # ---- TB / grid sizing ---------------------------------------------------
    # Target grid depth >= 8 (pipeline overlap; shards across v7x's 2 TCs via
    # "parallel") while capping M = TB*N at ~4K rows so live f32 intermediates
    # stay well inside v5e's 16 MiB default scoped VMEM.
    tb_depth = max(1, B_ // 8)
    tb_vmem = max(1, 4096 // N)
    TB = max(1, min(block_windows, tb_depth, tb_vmem))
    grid_b = pl.cdiv(B_, TB)
    if grid_b % 2:           # v7x: even grid -> both TensorCores equally loaded
        grid_b += 1
    B_pad = grid_b * TB
    if B_pad != B_:
        # Padded windows softmax over zero scores (uniform, no NaN) and are
        # sliced off below.
        x_bf = jnp.pad(x_bf, ((0, B_pad - B_), (0, 0), (0, 0)))

    flops_per_window = 2 * N * C * (3 * C) + 4 * H * N * N * D + 2 * N * C * C
    cost = pl.CostEstimate(
        flops=B_pad * flops_per_window,
        transcendentals=B_pad * H * N * N,
        bytes_accessed=(2 + 2) * B_pad * N * C           # bf16 in + bf16 out
        + 2 * (3 * C * C + C * C) + 4 * (3 * C + C),     # weights + biases
    )

    kernel = functools.partial(_window_attention_kernel,
                               num_heads=num_heads, exp_dtype=exp_dtype)

    out = pl.pallas_call(
        kernel,
        out_shape=jax.ShapeDtypeStruct((B_pad, N, C), jnp.bfloat16),
        grid_spec=pltpu.PrefetchScalarGridSpec(
            num_scalar_prefetch=0,
            grid=(grid_b,),
            in_specs=[
                pl.BlockSpec((TB, N, C), lambda b: (b, 0, 0)),   # x block
                pl.BlockSpec((C, 3 * C), lambda b: (0, 0)),      # fused w_qkv
                pl.BlockSpec((1, 3 * C), lambda b: (0, 0)),      # fused b_qkv
                pl.BlockSpec((C, C), lambda b: (0, 0)),          # w_proj
                pl.BlockSpec((1, C), lambda b: (0, 0)),          # b_proj
            ],
            out_specs=pl.BlockSpec((TB, N, C), lambda b: (b, 0, 0)),
        ),
        compiler_params=pltpu.CompilerParams(
            dimension_semantics=("parallel",)),
        cost_estimate=cost,
    )(x_bf, wqkv, bqkv, wp, bp)

    return out[:B_]


def reference(x, pos_emb, w_qkv, b_qkv, w_proj, b_proj, *, num_heads):
    # Pure-JAX f32 reference mirroring the PyTorch forward (eval mode).
    B_, N, C = x.shape
    D = C // num_heads
    scale = D ** (-0.5)
    x = x + pos_emb
    qkv = x @ w_qkv + b_qkv[0]                                   # (B, N, 3C)
    qkv = qkv.reshape(B_, N, 3, num_heads, D).transpose(2, 0, 3, 1, 4)
    q, k, v = qkv[0], qkv[1], qkv[2]                             # (B, H, N, D)
    attn = (q * scale) @ jnp.swapaxes(k, -2, -1)                 # (B, H, N, N)
    attn = jax.nn.softmax(attn, axis=-1)
    out = (attn @ v).transpose(0, 2, 1, 3).reshape(B_, N, C)
    return out @ w_proj + b_proj[0]


if __name__ == "__main__":
    # window_size = (2, 4, 2) -> N = 4*4*2 = 32 tokens; dim = 32; heads = 4.
    # 8 windows -> TB = 1, grid = (8,): even, pipelined, both v7x cores busy.
    B_, N, C, num_heads = 8, 32, 32, 4

    key = jax.random.PRNGKey(0)
    kx, kp, kw1, kb1, kw2, kb2 = jax.random.split(key, 6)

    x = jax.random.normal(kx, (B_, N, C), dtype=jnp.float32)
    # nn.Parameter(torch.zeros(...)) -> zeros at init; use small randoms so the
    # add path is exercised deterministically.
    pos_emb = 0.02 * jax.random.normal(kp, (1, N, C), dtype=jnp.float32)

    # Linear weights stored as (in, out) so the math is x @ W + b.
    w_qkv = 0.05 * jax.random.normal(kw1, (C, 3 * C), dtype=jnp.float32)
    b_qkv = 0.01 * jax.random.normal(kb1, (1, 3 * C), dtype=jnp.float32)
    w_proj = 0.05 * jax.random.normal(kw2, (C, C), dtype=jnp.float32)
    b_proj = 0.01 * jax.random.normal(kb2, (1, C), dtype=jnp.float32)

    out = window_attention(x, pos_emb, w_qkv, b_qkv, w_proj, b_proj,
                           num_heads=num_heads)
    out = jax.block_until_ready(out)

    ref = reference(x, pos_emb, w_qkv, b_qkv, w_proj, b_proj,
                    num_heads=num_heads)
    assert out.shape == (B_, N, C)
    out_f32 = out.astype(jnp.float32)
    max_err = jnp.max(jnp.abs(out_f32 - ref))
    # bf16 storage / bf16 output + approx reciprocal -> bf16-level tolerance.
    assert jnp.allclose(out_f32, ref, atol=2e-2, rtol=2e-2), f"max err {max_err}"

    print("KERNEL_OK")
</pallas_src>

<mosaic_0001>
module attributes {stable_mosaic.version = 11 : i64} {
  func.func @_window_attention_kernel(%arg0: i32, %arg1: memref<1x32x32xbf16, #tpu.memory_space<vmem>>, %arg2: memref<32x96xbf16, #tpu.memory_space<vmem>>, %arg3: memref<1x96xf32, #tpu.memory_space<vmem>>, %arg4: memref<32x32xbf16, #tpu.memory_space<vmem>>, %arg5: memref<1x32xf32, #tpu.memory_space<vmem>>, %arg6: memref<1x32x32xbf16, #tpu.memory_space<vmem>>) attributes {dimension_semantics = [#tpu.dimension_semantics<parallel>], iteration_bounds = array<i64: 8>, scalar_prefetch = 0 : i64, scratch_operands = 0 : i64, tpu.core_type = #tpu.core_type<tc>, window_params = [{transform_indices = @transform_0, window_bounds = array<i64: 1, 32, 32>}, {pipeline_mode = #tpu.pipeline_mode<synchronous>, transform_indices = @transform_1, window_bounds = array<i64: 32, 96>}, {pipeline_mode = #tpu.pipeline_mode<synchronous>, transform_indices = @transform_2, window_bounds = array<i64: 1, 96>}, {pipeline_mode = #tpu.pipeline_mode<synchronous>, transform_indices = @transform_3, window_bounds = array<i64: 32, 32>}, {pipeline_mode = #tpu.pipeline_mode<synchronous>, transform_indices = @transform_4, window_bounds = array<i64: 1, 32>}, {transform_indices = @transform_5, window_bounds = array<i64: 1, 32, 32>}]} {
    %c0 = arith.constant 0 : index
    %c0_0 = arith.constant 0 : index
    %c0_1 = arith.constant 0 : index
    %0 = vector.load %arg1[%c0, %c0_0, %c0_1] : memref<1x32x32xbf16, #tpu.memory_space<vmem>>, vector<1x32x32xbf16>
    %1 = vector.shape_cast %0 : vector<1x32x32xbf16> to vector<32x32xbf16>
    %c0_2 = arith.constant 0 : index
    %c0_3 = arith.constant 0 : index
    %2 = vector.load %arg2[%c0_2, %c0_3] : memref<32x96xbf16, #tpu.memory_space<vmem>>, vector<32x96xbf16>
    %cst = arith.constant dense<0.000000e+00> : vector<32x96xf32>
    %3 = tpu.matmul %1, %2, %cst {dimension_numbers = #tpu.dot_dimension_numbers<[1], [0], [0], [1], [0, 0, 1, 1], [], []>} : vector<32x32xbf16>, vector<32x96xbf16>, vector<32x96xf32> -> vector<32x96xf32>
    %c0_4 = arith.constant 0 : index
    %c0_5 = arith.constant 0 : index
    %4 = vector.load %arg3[%c0_4, %c0_5] : memref<1x96xf32, #tpu.memory_space<vmem>>, vector<1x96xf32>
    %5 = vector.broadcast %4 : vector<1x96xf32> to vector<32x96xf32>
    %6 = arith.addf %3, %5 : vector<32x96xf32>
    %7 = vector.extract_strided_slice %6 {offsets = [0, 0], sizes = [32, 8], strides = [1, 1]} : vector<32x96xf32> to vector<32x8xf32>
    %8 = vector.extract_strided_slice %6 {offsets = [0, 32], sizes = [32, 8], strides = [1, 1]} : vector<32x96xf32> to vector<32x8xf32>
    %9 = vector.extract_strided_slice %6 {offsets = [0, 64], sizes = [32, 8], strides = [1, 1]} : vector<32x96xf32> to vector<32x8xf32>
    %10 = vector.shape_cast %7 : vector<32x8xf32> to vector<1x32x8xf32>
    %11 = arith.truncf %10 : vector<1x32x8xf32> to vector<1x32x8xbf16>
    %12 = vector.shape_cast %8 : vector<32x8xf32> to vector<1x32x8xf32>
    %13 = arith.truncf %12 : vector<1x32x8xf32> to vector<1x32x8xbf16>
    %14 = vector.shape_cast %9 : vector<32x8xf32> to vector<1x32x8xf32>
    %15 = arith.truncf %14 : vector<1x32x8xf32> to vector<1x32x8xbf16>
    "tpu.trace_start"() <{level = 10 : i32, message = "bqd,bkd->bqk"}> : () -> ()
    %cst_6 = arith.constant dense<0.000000e+00> : vector<1x32x32xf32>
    %16 = tpu.matmul %11, %13, %cst_6 {dimension_numbers = #tpu.dot_dimension_numbers<[2], [2], [1], [1], [0, 0, 0, 1, 1, 1], [0], [0]>} : vector<1x32x8xbf16>, vector<1x32x8xbf16>, vector<1x32x32xf32> -> vector<1x32x32xf32>
    "tpu.trace_stop"() : () -> ()
    %cst_7 = arith.constant dense<0xFF800000> : vector<1x32xf32>
    %17 = vector.multi_reduction <maximumf>, %16, %cst_7 [2] : vector<1x32x32xf32> to vector<1x32xf32>
    %18 = vector.shape_cast %17 : vector<1x32xf32> to vector<1x32x1xf32>
    %19 = vector.broadcast %18 : vector<1x32x1xf32> to vector<1x32x32xf32>
    %20 = arith.subf %16, %19 : vector<1x32x32xf32>
    %21 = arith.truncf %20 : vector<1x32x32xf32> to vector<1x32x32xbf16>
    %22 = math.exp %21 : vector<1x32x32xbf16>
    %23 = arith.extf %22 : vector<1x32x32xbf16> to vector<1x32x32xf32>
    %cst_8 = arith.constant dense<0.000000e+00> : vector<1x32xf32>
    %24 = vector.multi_reduction <add>, %23, %cst_8 [2] : vector<1x32x32xf32> to vector<1x32xf32>
    %25 = vector.shape_cast %24 : vector<1x32xf32> to vector<1x32x1xf32>
    %26 = tpu.reciprocal %25 {approx = true} : vector<1x32x1xf32> -> vector<1x32x1xf32>
    %27 = vector.broadcast %26 : vector<1x32x1xf32> to vector<1x32x32xf32>
    %28 = arith.mulf %23, %27 : vector<1x32x32xf32>
    %29 = arith.truncf %28 : vector<1x32x32xf32> to vector<1x32x32xbf16>
    "tpu.trace_start"() <{level = 10 : i32, message = "bqk,bkd->bqd"}> : () -> ()
    %cst_9 = arith.constant dense<0.000000e+00> : vector<1x32x8xf32>
    %30 = tpu.matmul %29, %15, %cst_9 {dimension_numbers = #tpu.dot_dimension_numbers<[2], [1], [1], [2], [0, 0, 0, 1, 1, 2], [0], [0]>} : vector<1x32x32xbf16>, vector<1x32x8xbf16>, vector<1x32x8xf32> -> vector<1x32x8xf32>
    "tpu.trace_stop"() : () -> ()
    %31 = vector.shape_cast %30 : vector<1x32x8xf32> to vector<32x8xf32>
    %32 = arith.truncf %31 : vector<32x8xf32> to vector<32x8xbf16>
    %33 = vector.extract_strided_slice %6 {offsets = [0, 8], sizes = [32, 8], strides = [1, 1]} : vector<32x96xf32> to vector<32x8xf32>
    %34 = vector.extract_strided_slice %6 {offsets = [0, 40], sizes = [32, 8], strides = [1, 1]} : vector<32x96xf32> to vector<32x8xf32>
    %35 = vector.extract_strided_slice %6 {offsets = [0, 72], sizes = [32, 8], strides = [1, 1]} : vector<32x96xf32> to vector<32x8xf32>
    %36 = vector.shape_cast %33 : vector<32x8xf32> to vector<1x32x8xf32>
    %37 = arith.truncf %36 : vector<1x32x8xf32> to vector<1x32x8xbf16>
    %38 = vector.shape_cast %34 : vector<32x8xf32> to vector<1x32x8xf32>
    %39 = arith.truncf %38 : vector<1x32x8xf32> to vector<1x32x8xbf16>
    %40 = vector.shape_cast %35 : vector<32x8xf32> to vector<1x32x8xf32>
    %41 = arith.truncf %40 : vector<1x32x8xf32> to vector<1x32x8xbf16>
    "tpu.trace_start"() <{level = 10 : i32, message = "bqd,bkd->bqk"}> : () -> ()
    %cst_10 = arith.constant dense<0.000000e+00> : vector<1x32x32xf32>
    %42 = tpu.matmul %37, %39, %cst_10 {dimension_numbers = #tpu.dot_dimension_numbers<[2], [2], [1], [1], [0, 0, 0, 1, 1, 1], [0], [0]>} : vector<1x32x8xbf16>, vector<1x32x8xbf16>, vector<1x32x32xf32> -> vector<1x32x32xf32>
    "tpu.trace_stop"() : () -> ()
    %cst_11 = arith.constant dense<0xFF800000> : vector<1x32xf32>
    %43 = vector.multi_reduction <maximumf>, %42, %cst_11 [2] : vector<1x32x32xf32> to vector<1x32xf32>
    %44 = vector.shape_cast %43 : vector<1x32xf32> to vector<1x32x1xf32>
    %45 = vector.broadcast %44 : vector<1x32x1xf32> to vector<1x32x32xf32>
    %46 = arith.subf %42, %45 : vector<1x32x32xf32>
    %47 = arith.truncf %46 : vector<1x32x32xf32> to vector<1x32x32xbf16>
    %48 = math.exp %47 : vector<1x32x32xbf16>
    %49 = arith.extf %48 : vector<1x32x32xbf16> to vector<1x32x32xf32>
    %cst_12 = arith.constant dense<0.000000e+00> : vector<1x32xf32>
    %50 = vector.multi_reduction <add>, %49, %cst_12 [2] : vector<1x32x32xf32> to vector<1x32xf32>
    %51 = vector.shape_cast %50 : vector<1x32xf32> to vector<1x32x1xf32>
    %52 = tpu.reciprocal %51 {approx = true} : vector<1x32x1xf32> -> vector<1x32x1xf32>
    %53 = vector.broadcast %52 : vector<1x32x1xf32> to vector<1x32x32xf32>
    %54 = arith.mulf %49, %53 : vector<1x32x32xf32>
    %55 = arith.truncf %54 : vector<1x32x32xf32> to vector<1x32x32xbf16>
    "tpu.trace_start"() <{level = 10 : i32, message = "bqk,bkd->bqd"}> : () -> ()
    %cst_13 = arith.constant dense<0.000000e+00> : vector<1x32x8xf32>
    %56 = tpu.matmul %55, %41, %cst_13 {dimension_numbers = #tpu.dot_dimension_numbers<[2], [1], [1], [2], [0, 0, 0, 1, 1, 2], [0], [0]>} : vector<1x32x32xbf16>, vector<1x32x8xbf16>, vector<1x32x8xf32> -> vector<1x32x8xf32>
    "tpu.trace_stop"() : () -> ()
    %57 = vector.shape_cast %56 : vector<1x32x8xf32> to vector<32x8xf32>
    %58 = arith.truncf %57 : vector<32x8xf32> to vector<32x8xbf16>
    %59 = vector.extract_strided_slice %6 {offsets = [0, 16], sizes = [32, 8], strides = [1, 1]} : vector<32x96xf32> to vector<32x8xf32>
    %60 = vector.extract_strided_slice %6 {offsets = [0, 48], sizes = [32, 8], strides = [1, 1]} : vector<32x96xf32> to vector<32x8xf32>
    %61 = vector.extract_strided_slice %6 {offsets = [0, 80], sizes = [32, 8], strides = [1, 1]} : vector<32x96xf32> to vector<32x8xf32>
    %62 = vector.shape_cast %59 : vector<32x8xf32> to vector<1x32x8xf32>
    %63 = arith.truncf %62 : vector<1x32x8xf32> to vector<1x32x8xbf16>
    %64 = vector.shape_cast %60 : vector<32x8xf32> to vector<1x32x8xf32>
    %65 = arith.truncf %64 : vector<1x32x8xf32> to vector<1x32x8xbf16>
    %66 = vector.shape_cast %61 : vector<32x8xf32> to vector<1x32x8xf32>
    %67 = arith.truncf %66 : vector<1x32x8xf32> to vector<1x32x8xbf16>
    "tpu.trace_start"() <{level = 10 : i32, message = "bqd,bkd->bqk"}> : () -> ()
    %cst_14 = arith.constant dense<0.000000e+00> : vector<1x32x32xf32>
    %68 = tpu.matmul %63, %65, %cst_14 {dimension_numbers = #tpu.dot_dimension_numbers<[2], [2], [1], [1], [0, 0, 0, 1, 1, 1], [0], [0]>} : vector<1x32x8xbf16>, vector<1x32x8xbf16>, vector<1x32x32xf32> -> vector<1x32x32xf32>
    "tpu.trace_stop"() : () -> ()
    %cst_15 = arith.constant dense<0xFF800000> : vector<1x32xf32>
    %69 = vector.multi_reduction <maximumf>, %68, %cst_15 [2] : vector<1x32x32xf32> to vector<1x32xf32>
    %70 = vector.shape_cast %69 : vector<1x32xf32> to vector<1x32x1xf32>
    %71 = vector.broadcast %70 : vector<1x32x1xf32> to vector<1x32x32xf32>
    %72 = arith.subf %68, %71 : vector<1x32x32xf32>
    %73 = arith.truncf %72 : vector<1x32x32xf32> to vector<1x32x32xbf16>
    %74 = math.exp %73 : vector<1x32x32xbf16>
    %75 = arith.extf %74 : vector<1x32x32xbf16> to vector<1x32x32xf32>
    %cst_16 = arith.constant dense<0.000000e+00> : vector<1x32xf32>
    %76 = vector.multi_reduction <add>, %75, %cst_16 [2] : vector<1x32x32xf32> to vector<1x32xf32>
    %77 = vector.shape_cast %76 : vector<1x32xf32> to vector<1x32x1xf32>
    %78 = tpu.reciprocal %77 {approx = true} : vector<1x32x1xf32> -> vector<1x32x1xf32>
    %79 = vector.broadcast %78 : vector<1x32x1xf32> to vector<1x32x32xf32>
    %80 = arith.mulf %75, %79 : vector<1x32x32xf32>
    %81 = arith.truncf %80 : vector<1x32x32xf32> to vector<1x32x32xbf16>
    "tpu.trace_start"() <{level = 10 : i32, message = "bqk,bkd->bqd"}> : () -> ()
    %cst_17 = arith.constant dense<0.000000e+00> : vector<1x32x8xf32>
    %82 = tpu.matmul %81, %67, %cst_17 {dimension_numbers = #tpu.dot_dimension_numbers<[2], [1], [1], [2], [0, 0, 0, 1, 1, 2], [0], [0]>} : vector<1x32x32xbf16>, vector<1x32x8xbf16>, vector<1x32x8xf32> -> vector<1x32x8xf32>
    "tpu.trace_stop"() : () -> ()
    %83 = vector.shape_cast %82 : vector<1x32x8xf32> to vector<32x8xf32>
    %84 = arith.truncf %83 : vector<32x8xf32> to vector<32x8xbf16>
    %85 = vector.extract_strided_slice %6 {offsets = [0, 24], sizes = [32, 8], strides = [1, 1]} : vector<32x96xf32> to vector<32x8xf32>
    %86 = vector.extract_strided_slice %6 {offsets = [0, 56], sizes = [32, 8], strides = [1, 1]} : vector<32x96xf32> to vector<32x8xf32>
    %87 = vector.extract_strided_slice %6 {offsets = [0, 88], sizes = [32, 8], strides = [1, 1]} : vector<32x96xf32> to vector<32x8xf32>
    %88 = vector.shape_cast %85 : vector<32x8xf32> to vector<1x32x8xf32>
    %89 = arith.truncf %88 : vector<1x32x8xf32> to vector<1x32x8xbf16>
    %90 = vector.shape_cast %86 : vector<32x8xf32> to vector<1x32x8xf32>
    %91 = arith.truncf %90 : vector<1x32x8xf32> to vector<1x32x8xbf16>
    %92 = vector.shape_cast %87 : vector<32x8xf32> to vector<1x32x8xf32>
    %93 = arith.truncf %92 : vector<1x32x8xf32> to vector<1x32x8xbf16>
    "tpu.trace_start"() <{level = 10 : i32, message = "bqd,bkd->bqk"}> : () -> ()
    %cst_18 = arith.constant dense<0.000000e+00> : vector<1x32x32xf32>
    %94 = tpu.matmul %89, %91, %cst_18 {dimension_numbers = #tpu.dot_dimension_numbers<[2], [2], [1], [1], [0, 0, 0, 1, 1, 1], [0], [0]>} : vector<1x32x8xbf16>, vector<1x32x8xbf16>, vector<1x32x32xf32> -> vector<1x32x32xf32>
    "tpu.trace_stop"() : () -> ()
    %cst_19 = arith.constant dense<0xFF800000> : vector<1x32xf32>
    %95 = vector.multi_reduction <maximumf>, %94, %cst_19 [2] : vector<1x32x32xf32> to vector<1x32xf32>
    %96 = vector.shape_cast %95 : vector<1x32xf32> to vector<1x32x1xf32>
    %97 = vector.broadcast %96 : vector<1x32x1xf32> to vector<1x32x32xf32>
    %98 = arith.subf %94, %97 : vector<1x32x32xf32>
    %99 = arith.truncf %98 : vector<1x32x32xf32> to vector<1x32x32xbf16>
    %100 = math.exp %99 : vector<1x32x32xbf16>
    %101 = arith.extf %100 : vector<1x32x32xbf16> to vector<1x32x32xf32>
    %cst_20 = arith.constant dense<0.000000e+00> : vector<1x32xf32>
    %102 = vector.multi_reduction <add>, %101, %cst_20 [2] : vector<1x32x32xf32> to vector<1x32xf32>
    %103 = vector.shape_cast %102 : vector<1x32xf32> to vector<1x32x1xf32>
    %104 = tpu.reciprocal %103 {approx = true} : vector<1x32x1xf32> -> vector<1x32x1xf32>
    %105 = vector.broadcast %104 : vector<1x32x1xf32> to vector<1x32x32xf32>
    %106 = arith.mulf %101, %105 : vector<1x32x32xf32>
    %107 = arith.truncf %106 : vector<1x32x32xf32> to vector<1x32x32xbf16>
    "tpu.trace_start"() <{level = 10 : i32, message = "bqk,bkd->bqd"}> : () -> ()
    %cst_21 = arith.constant dense<0.000000e+00> : vector<1x32x8xf32>
    %108 = tpu.matmul %107, %93, %cst_21 {dimension_numbers = #tpu.dot_dimension_numbers<[2], [1], [1], [2], [0, 0, 0, 1, 1, 2], [0], [0]>} : vector<1x32x32xbf16>, vector<1x32x8xbf16>, vector<1x32x8xf32> -> vector<1x32x8xf32>
    "tpu.trace_stop"() : () -> ()
    %109 = vector.shape_cast %108 : vector<1x32x8xf32> to vector<32x8xf32>
    %110 = arith.truncf %109 : vector<32x8xf32> to vector<32x8xbf16>
    %111 = tpu.concatenate %32, %58, %84, %110 in 1 : vector<32x8xbf16>, vector<32x8xbf16>, vector<32x8xbf16>, vector<32x8xbf16> -> vector<32x32xbf16>
    %c0_22 = arith.constant 0 : index
    %c0_23 = arith.constant 0 : index
    %112 = vector.load %arg4[%c0_22, %c0_23] : memref<32x32xbf16, #tpu.memory_space<vmem>>, vector<32x32xbf16>
    %cst_24 = arith.constant dense<0.000000e+00> : vector<32x32xf32>
    %113 = tpu.matmul %111, %112, %cst_24 {dimension_numbers = #tpu.dot_dimension_numbers<[1], [0], [0], [1], [0, 0, 1, 1], [], []>} : vector<32x32xbf16>, vector<32x32xbf16>, vector<32x32xf32> -> vector<32x32xf32>
    %c0_25 = arith.constant 0 : index
    %c0_26 = arith.constant 0 : index
    %114 = vector.load %arg5[%c0_25, %c0_26] : memref<1x32xf32, #tpu.memory_space<vmem>>, vector<1x32xf32>
    %115 = vector.broadcast %114 : vector<1x32xf32> to vector<32x32xf32>
    %116 = arith.addf %113, %115 : vector<32x32xf32>
    %117 = vector.shape_cast %116 : vector<32x32xf32> to vector<1x32x32xf32>
    %118 = arith.truncf %117 : vector<1x32x32xf32> to vector<1x32x32xbf16>
    %c0_27 = arith.constant 0 : index
    %c0_28 = arith.constant 0 : index
    %c0_29 = arith.constant 0 : index
    %119 = vector.load %arg6[%c0_27, %c0_28, %c0_29] : memref<1x32x32xbf16, #tpu.memory_space<vmem>>, vector<1x32x32xbf16>
    tpu.vector_store %arg6[%c0_27, %c0_28, %c0_29], %118 {strides = array<i32>} : memref<1x32x32xbf16, #tpu.memory_space<vmem>>, vector<1x32x32xbf16>,
    return
  }
  func.func @transform_0(%arg0: i32) -> (i32, i32, i32) {
    %c0_i32 = arith.constant 0 : i32
    %c0_i32_0 = arith.constant 0 : i32
    %c0_i32_1 = arith.constant 0 : i32
    return %arg0, %c0_i32, %c0_i32_0 : i32, i32, i32
  }
  func.func @transform_1(%arg0: i32) -> (i32, i32) {
    %c0_i32 = arith.constant 0 : i32
    %c0_i32_0 = arith.constant 0 : i32
    %c0_i32_1 = arith.constant 0 : i32
    return %c0_i32, %c0_i32_0 : i32, i32
  }
  func.func @transform_2(%arg0: i32) -> (i32, i32) {
    %c0_i32 = arith.constant 0 : i32
    %c0_i32_0 = arith.constant 0 : i32
    %c0_i32_1 = arith.constant 0 : i32
    return %c0_i32, %c0_i32_0 : i32, i32
  }
  func.func @transform_3(%arg0: i32) -> (i32, i32) {
    %c0_i32 = arith.constant 0 : i32
    %c0_i32_0 = arith.constant 0 : i32
    %c0_i32_1 = arith.constant 0 : i32
    return %c0_i32, %c0_i32_0 : i32, i32
  }
  func.func @transform_4(%arg0: i32) -> (i32, i32) {
    %c0_i32 = arith.constant 0 : i32
    %c0_i32_0 = arith.constant 0 : i32
    %c0_i32_1 = arith.constant 0 : i32
    return %c0_i32, %c0_i32_0 : i32, i32
  }
  func.func @transform_5(%arg0: i32) -> (i32, i32, i32) {
    %c0_i32 = arith.constant 0 : i32
    %c0_i32_0 = arith.constant 0 : i32
    %c0_i32_1 = arith.constant 0 : i32
    return %arg0, %c0_i32, %c0_i32_0 : i32, i32, i32
  }
}

</mosaic_0001>

<bundles_post_ra>
// kernel: tpu_custom_call.1
= control target key start
LH: loop header
LB: loop body
LE: loop exit
PB: predicated region body
PF: predicated region fallthrough
CT: control target
= control target key end

     0   :  { %10 = vsyncpa [#allocation3], 0  ;;  %s2206_s0 = inlined_call_operand.hbm [shape: bf16[8,32,32], index: 0, kind: input, shape index: {}]   ;;  %s2207_s1 = inlined_call_operand.hbm [shape: bf16[32,96], index: 1, kind: input, shape index: {}]   ;;  %s2208_s2 = inlined_call_operand.vmem [shape: f32[1,96], index: 2, kind: input, shape index: {}]   ;;  %s2209_s3 = inlined_call_operand.hbm [shape: bf16[32,32], index: 3, kind: input, shape index: {}]   ;;  %s2210_s4 = inlined_call_operand.vmem [shape: f32[1,32], index: 4, kind: input, shape index: {}]   ;;  %s2211_s5 = inlined_call_operand.hbm [shape: bf16[8,32,32], index: 5, kind: output, shape index: {}]  }
   0x1   :  { %12 = vsyncpa [#allocation3 + $0x1], 0 }
   0x2   :  { %13 = vsyncpa [#allocation6], 0 }
   0x3   :  { %14 = vsyncpa [#allocation4], 0 }
   0x4   :  { %16 = vsyncpa [#allocation4 + $0x1], 0  ;;  %s1855_s18 = smov 0   ;;  %s1857_s19 = smov 0  }
   0x5   :  { %s1859_s20 = smov 0   ;;  %s1861_s21 = smov 0  }
   0x6 LB: > { %s1876_s22 = sadd.s32 4294967295, %s1802_s21   ;;  %s1332_s23 = sadd.s32 4294967294, %s1802_s21   ;;  %s1802_s21 = sphi %s1861_s21, %s2233_s21   ;;  %s1798_s20 = sphi %s1859_s20, %s2232_s20   ;;  %s1794_s19 = sphi %s1857_s19, %s2231_s19   ;;  %s1790_s18 = sphi %s1855_s18, %s2230_s18  }
   0x7   : > { %p42_p0 = scmp.ne.s32.totalorder %s1794_s19, %s1790_s18  ;;  %p2212_p1 = scmp.eq.s32.totalorder %s1876_s22, 0 }
   0x8   : > { %p150_p2 = scmp.eq.s32.totalorder %s1876_s22, 7  ;;  %p156_p3 = scmp.eq.s32.totalorder %s1332_s23, 7 }
   0x9   : > { %p1885_p4 = por %p2212_p1, %p42_p0  ;;  %p1333_p5 = scmp.ge.s32.totalorder %s1802_s21, 1 }
   0xa   : > { %p1890_p6 = por %p156_p3, %p42_p0  ;;  %p163_p7 = scmp.lt.s32.totalorder %s1802_s21, 9 }
   0xb   : > { %s2217_s24 = scalar_select %p1885_p4, 1, 0 }
   0xc   : > { %s2218_s25 = scalar_select %p1890_p6, 1, 0 }
   0xd   : > { %p1895_p8 = pnand %p1333_p5, %p163_p7  ;;  %s1804_s27 = smov [#allocation5]  }
   0xe   : > { %s175_s28 = sshll.u32 %s1804_s27, 4  ;;  %s1805_s30 = smov [#allocation7]   ;;  %s176_s28 = int_to_ptr.vmem [resolvable:$true] %s175_s28 }
   0xf   : > { %s2219_s26 = scalar_select %p1895_p8, 1, 0 }
  0x10   : > { %p1528_p9 = pneg %p1895_p8  ;;  %s191_s6 = sshll.u32 %s1805_s30, 4  ;;  %s192_s6 = int_to_ptr.vmem [resolvable:$true] %s191_s6 }
  0x11   : > { %s1665_s7 = scalar_lea.vmem %s176_s28, 256  ;;  %p1673_p3 = scmp.lt.s32.totalorder %s176_s28, %s176_s28 }
  0x12   : > { %p1903_p10 = pnand %p1528_p9, %p2212_p1  ;;  %p1666_p12 = scmp.ne.s32.totalorder %s176_s28, %s1665_s7 }
  0x13   : > { %p1674_p5 = scmp.lt.s32.totalorder %s1665_s7, %s1665_s7 }
  0x14   : > { %p1656_p11 = pneg %p1903_p10 }
  0x15   : > { %p1675_p7 = por %p1674_p5, %p1673_p3 }
  0x16   : > { %p1668_p13 = pnand %p1666_p12, %p1656_p11 }
  0x18   : > { %p1669_p0 = pneg %p1668_p13 }
  0x1a   : > { %p1676_p9 = pnand %p1675_p7, %p1669_p0 }
  0x1c   : > { %1679 = shalt.err (!%p1676_p9)
}
  0x1d   : > { %s2213_s8 = smov 64   ;;  %s1807_s9 = smov 4  }
  0x1e   : > { %1531 = dma.hbm_to_vmem [thread:$0]  (!%p1903_p10), %s2207_s1, 256, %s176_s28, [#allocation6], %s2213_s8, %s2213_s8, %s1807_s9  }
  0x1f   : > { %s1691_s12 = scalar_lea.vmem %s192_s6, 256  ;;  %p1699_p0 = scmp.lt.s32.totalorder %s192_s6, %s192_s6 }
  0x20   : > { %p1692_p12 = scmp.ne.s32.totalorder %s192_s6, %s1691_s12  ;;  %p1700_p5 = scmp.lt.s32.totalorder %s1691_s12, %s1691_s12 }
  0x22   : > { %p1694_p13 = pnand %p1692_p12, %p1656_p11  ;;  %p1701_p7 = por %p1700_p5, %p1699_p0 }
  0x24   : > { %p1695_p3 = pneg %p1694_p13 }
  0x26   : > { %p1702_p9 = pnand %p1701_p7, %p1695_p3 }
  0x28   : > { %1705 = shalt.err (!%p1702_p9)
}
  0x29   : > { %1534 = dma.hbm_to_vmem [thread:$0]  (!%p1903_p10), %s2209_s3, 256, %s192_s6, [#allocation6], %s2213_s8, %s2213_s8, %s1807_s9  }
  0x2a   : > { %s1932_s15 = sadd.s32 1, %s1802_s21   ;;  %s29_s16 = sadd.s32 1, %s1798_s20 }
  0x2b   : > { %s26_s17 = ssub.s32 %s1802_s21, %s1932_s15  ;;  %p36_p11 = scmp.ne.s32.totalorder %s1798_s20, %s1794_s19 }
  0x2c   : > { %p27_p12 = scmp.eq.s32.totalorder %s26_s17, 0  ;;  %p37_p13 = scmp.eq.s32.totalorder %s1802_s21, 0 }
  0x2d   : > { %p1942_p3 = por %p150_p2, %p36_p11  ;;  %p1545_p0 = scmp.lt.s32.totalorder %s1802_s21, 8 }
  0x2e   : > { %s1948_s27 = scalar_select %p27_p12, %s1798_s20, %s29_s16  }
  0x2f   : > { %s2221_s23 = scalar_select %p1942_p3, 1, 0 }
  0x30   : > { %p38_p5 = por %p37_p13, %p36_p11  ;;  %s208_s28 = sand.u32 1, %s1798_s20  }
  0x31   : > { %s1337_s29 = sshll.u32 %s208_s28, 4  ;;  %s1382_s30 = sshll.u32 %s1802_s21, 8 }
  0x32   : > { %s1955_s10 = scalar_lea.hbm %s2206_s0, %s1382_s30  ;;  %s212_s11 = scalar_lea.vmem [#allocation2], %s1337_s29 }
  0x33   : > { %s219_s12 = sshll.u32 %s212_s11, 4  ;;  %p1959_p2 = pnand %p1545_p0, %p38_p5  ;;  %s1957_s12 = int_to_ptr.vmem [resolvable:$true] %s219_s12 }
  0x34   : > { %s1963_s14 = scalar_lea.sflag [#allocation3], %s208_s28  ;;  %s1706_s16 = scalar_lea.hbm %s1955_s10, 256 }
  0x35   : > { %p1707_p10 = scmp.ne.s32.totalorder %s1955_s10, %s1706_s16  ;;  %p1708_p7 = pneg %p1959_p2 }
  0x36   : > { %s1711_s29 = scalar_lea.hbm %s2206_s0, 2048  ;;  %p1712_p12 = scmp.lt.s32.totalorder %s1955_s10, %s2206_s0 }
  0x37   : > { %p1709_p9 = pnand %p1708_p7, %p1707_p10  ;;  %p1713_p13 = scmp.lt.s32.totalorder %s1711_s29, %s1706_s16 }
  0x39   : > { %p1710_p11 = pneg %p1709_p9  ;;  %p1714_p0 = por %p1713_p13, %p1712_p12 }
  0x3b   : > { %p1715_p5 = pnand %p1714_p0, %p1710_p11 }
  0x3d   : > { %1718 = shalt.err (!%p1715_p5)
}
  0x3e   : > { %s1719_s28 = scalar_lea.vmem %s1957_s12, 256  ;;  %s1808_s11 = smov [#allocation2]  }
  0x3f   : > { %p1720_p1 = scmp.ne.s32.totalorder %s1957_s12, %s1719_s28  ;;  %s1724_s8 = sshll.u32 %s1808_s11, 4  ;;  %s1725_s8 = int_to_ptr.vmem [resolvable:$false] %s1724_s8 }
  0x40   : > { %s1726_s17 = scalar_lea.vmem %s1725_s8, 512  ;;  %p1727_p9 = scmp.lt.s32.totalorder %s1957_s12, %s1725_s8 }
  0x41   : > { %p1722_p6 = pnand %p1720_p1, %p1708_p7  ;;  %p1728_p3 = scmp.lt.s32.totalorder %s1726_s17, %s1719_s28 }
  0x43   : > { %p1723_p10 = pneg %p1722_p6  ;;  %p1729_p4 = por %p1728_p3, %p1727_p9 }
  0x45   : > { %p1730_p8 = pnand %p1729_p4, %p1723_p10 }
  0x47   : > { %1733 = shalt.err (!%p1730_p8)
}
  0x48   : > { %s2223_s16 = smov 64   ;;  %p2224_p1 = scmp.ne.s32.totalorder %s2219_s26, 0 }
  0x49   : > { %1538 = dma.hbm_to_vmem [thread:$0]  (!%p1959_p2), %s1955_s10, 256, %s1957_s12, %s1963_s14, %s2223_s16, %s2223_s16, %s1807_s9  }
  0x4a   : > { %231 = sbr.rel (%p2224_p1) target bundleno = 3126 (0xc36), region = 40  ;;  %s1990_s30 = sand.u32 (!%p2224_p1), 1, %s1794_s19  }
  0x4b   : > { %s1341_s8 = sshll.u32 (!%p2224_p1), %s1990_s30, 4  ;;  %s234_s29 = scalar_lea.sflag (!%p2224_p1), [#allocation3], %s1990_s30 }
  0x4c   : > { %s237_s13 = scalar_lea.vmem (!%p2224_p1), [#allocation2], %s1341_s8  ;;  %p2225_p4 = scmp.ne.s32.totalorder (!%p2224_p1), %s2217_s24, 0 }
  0x4f   : > { %1777 = dma.done.wait (%p2225_p4), %s234_s29, 256  }
  0x50   : > { %1779 = vsyncadd (%p2225_p4), %s234_s29, 4294967040  ;;  %p2226_p6 = scmp.eq.s32.totalorder %s1876_s22, 0 }
  0x52   : > { %1781 = dma.done.wait (%p2226_p6), [#allocation6], 512   ;;  %p2227_p8 = pmov %p2226_p6 }
  0x53   : > { %v1600_v0 = vld [vmem:[#allocation5 + $0x8] sm:$0xff]   ;;  %v1601_v1 = vld [vmem:[#allocation5] sm:$0xff]   ;;  %vm310_vm0 = vcmask 261120   ;;  %vm374_vm1 = vcmask 64512   ;;  %s1809_s9 = smov 96   ;;  %s1810_s10 = smov 64  }
  0x54   : > { %1783 = vsyncadd (%p2227_p8), [#allocation6], 4294966784  ;;  %1428 = vmatprep.subr.bf16.mxu0 %v1600_v0  ;;  %v1602_v2 = vld [vmem:[%s237_s13] sm:$0xff]   ;;  %v1603_v3 = vld [vmem:[%s237_s13 + $0x8] sm:$0xff]   ;;  %s1811_s12 = smov 88   ;;  %s1812_s14 = smov 120  }
  0x55   : > { %1429 = vmatpush3.bf16.msra.mxu0 %v1600_v0  ;;  %1432 = vmatprep.mubr.msk.bf16.mxu0 %vm310_vm0, %v1602_v2  ;;  %v1345_v5 = vld [vmem:[%s2208_s2] ss:$0 sm:$0xff]  ;;  %s1813_s6 = smov 56   ;;  %s1814_s7 = smov 80   ;;  %vm1119_vm2 = vcmask 130048   ;;  %vm1124_vm3 = vcmask 195584  }
  0x56   : > { %1430 = vmatprep.subr.bf16.mxu0 %v1601_v1  ;;  %s1815_s28 = smov 112   ;;  %s1816_s11 = smov 48   ;;  %vm1221_vm4 = vcmask 257024  }
  0x57   : > { %s1817_s17 = smov 72   ;;  %s1818_s16 = smov 104  }
  0x58   : > { %s1819_s29 = smov 40   ;;  %s1820_s13 = smov 8  }
  0x59   : > { %1431 = vmatpush3.bf16.msra.mxu0 %v1601_v1  ;;  %s1821_s24 = smov 16   ;;  %s1822_s26 = smov 24  }
  0x5a   : > { %p2228_p2 = scmp.ne.s32.totalorder %s2221_s23, 0 }
  0x5c   : > { %1433 = vmatmul.mubr.msk.bf16.vlgmr.msra.gmra.mxu0 %vm310_vm0, %v1603_v3 }
 0x11c   : > { %v1434_v4 = vpop.f32.mrf.mxu0 }
 0x11d   : > { %v360_v8 = vadd.f32 %v1434_v4, %v1345_v5 }
 0x11e   : > { %v351_v6 = vpop.f32.mrf.mxu0 }
 0x11f   : > { %v352_v11 = vadd.f32 %v1345_v5, %v351_v6 }
 0x120   : > { %v1435_v7 = vpop.f32.mrf.mxu0 }
 0x121   : > { %v363_v9 = vadd.f32 %v1435_v7, %v1345_v5 }
 0x122   : > { %v354_v10 = vpop.f32.mrf.mxu0 }
 0x123   : > { %v2009_v12 = vpack.c.bf16 %v363_v9, %v360_v8  ;;  %v355_v13 = vadd.f32 %v1345_v5, %v354_v10 }
 0x125   : > { %v2011_v14 = vpack.c.bf16 %v355_v13, %v352_v11  ;;  %372 = vrot.lane.b32.xlu0 %v2009_v12, %s1809_s9 }
 0x127   : > { %1440 = vmatprep.mubr.msk.bf16.mxu1 %vm374_vm1, %v2011_v14 }
 0x129   : > { %370 = vrot.lane.b32.xlu0 %v2011_v14, %s1809_s9 }
 0x197   : > { %v373_v15 = vpop.permute.xlu0 %372 }
 0x198   : > { %1508 = vmatprep.subr.msk.bf16.mxu1 %vm374_vm1, %v373_v15  ;;  %v385_v16 = vsel %vm374_vm1, %v373_v15, 0 }
 0x199   : > { %1437 = vmatpush3.bf16.xpose.msra.mxu1 %v385_v16 }
 0x19b   : > { %v371_v17 = vpop.permute.xlu0 %370 }
 0x19c   : > { %1509 = vmatprep.subr.msk.bf16.mxu1 %vm374_vm1, %v371_v17  ;;  %v382_v18 = vsel %vm374_vm1, %v371_v17, 0 }
 0x1a1   : > { %1439 = vmatpush3.bf16.xpose.msra.mxu1 %v382_v18 }
 0x1a8   : > { %1441 = vmatmul.mubr.msk.bf16.vlgmr.msra.gmra.mxu1 %vm374_vm1, %v2009_v12 }
 0x268   : > { %v1442_v19 = vpop.f32.mrf.mxu1 }
 0x269   : > { %v442_v20 = vsel %vm310_vm0, %v1442_v19, -inf }
 0x26a   : > { %443 = vmax.xlane.f32.xlu0 %v442_v20  ;;  %v421_v21 = vpop.f32.mrf.mxu1 }
 0x26b   : > { %v436_v22 = vsel %vm310_vm0, %v421_v21, -inf }
 0x26c   : > { %437 = vmax.xlane.f32.xlu1 %v436_v22  ;;  %v1443_v23 = vpop.f32.mrf.mxu1 }
 0x26d   : > { %v445_v26 = vsel %vm310_vm0, %v1443_v23, -inf }
 0x26e   : > { %v424_v24 = vpop.f32.mrf.mxu1 }
 0x26f   : > { %v439_v25 = vsel %vm310_vm0, %v424_v24, -inf }
 0x270   : > { %440 = vmax.xlane.f32.xlu1 %v439_v25 }
 0x274   : > { %446 = vmax.xlane.f32.xlu1 %v445_v26 }
 0x280   : > { %486 = vrot.lane.b32.xlu0 %v2011_v14, %s1810_s10 }
 0x285   : > { %488 = vrot.lane.b32.xlu1 %v2009_v12, %s1810_s10 }
 0x2f3   : > { %v444_v29 = vpop.xlane.xlu0 %443 }
 0x2f4   : > { %v450_v32 = vsub.f32 %v1442_v19, %v444_v29 }
 0x2f5   : > { %v438_v27 = vpop.xlane.xlu1 %437 }
 0x2f6   : > { %v448_v33 = vsub.f32 %v421_v21, %v438_v27 }
 0x2f7   : > { %v487_v39 = vpop.permute.xlu0 %486 }
 0x2f9   : > { %v441_v28 = vpop.xlane.xlu1 %440 }
 0x2fa   : > { %v449_v30 = vsub.f32 %v424_v24, %v441_v28 }
 0x2fc   : > { %v452_v35 = vpack.c.bf16 %v449_v30, %v448_v33 }
 0x2fd   : > { %v447_v31 = vpop.xlane.xlu1 %446 }
 0x2fe   : > { %v451_v34 = vsub.f32 %v1443_v23, %v447_v31  ;;  %v455_v40 = vmul.bf16 1069105081, %v452_v35 }
 0x300   : > { %v453_v36 = vpack.c.bf16 %v451_v34, %v450_v32 }
 0x301   : > { %v489_v37 = vpop.permute.xlu1 %488 }
 0x302   : > { %v458_v38 = vmul.bf16 1069105081, %v453_v36  ;;  %1444 = vmatprep.subr.bf16.mxu0 %v489_v37 }
 0x303   : > { %1445 = vmatpush3.bf16.msra.mxu0 %v489_v37 }
 0x304   : > { %1606 = vpow.bf16 %v458_v38  ;;  %1446 = vmatprep.subr.bf16.mxu0 %v487_v39 }
 0x305   : > { %1608 = vpow.bf16 %v455_v40 }
 0x307   : > { %1447 = vmatpush3.bf16.msra.mxu0 %v487_v39 }
 0x312   : > { %v1607_v41 = vpop.eup %1606 }
 0x313   : > { %v462_v42 = vunpack.c.l.bf16 %v1607_v41  ;;  %v463_v44 = vunpack.c.h.bf16 %v1607_v41  ;;  %v1609_v45 = vpop.eup %1608 }
 0x314   : > { %v460_v47 = vunpack.c.l.bf16 %v1609_v45  ;;  %v461_v49 = vunpack.c.h.bf16 %v1609_v45 }
 0x315   : > { %v470_v43 = vsel %vm310_vm0, %v462_v42, 0.0  ;;  %v473_v46 = vsel %vm310_vm0, %v463_v44, 0.0 }
 0x316   : > { %471 = vadd.xlane.f32.xlu1 %v470_v43  ;;  %v464_v48 = vsel %vm310_vm0, %v460_v47, 0.0  ;;  %v467_v50 = vsel %vm310_vm0, %v461_v49, 0.0 }
 0x31a   : > { %474 = vadd.xlane.f32.xlu1 %v473_v46 }
 0x31e   : > { %465 = vadd.xlane.f32.xlu1 %v464_v48 }
 0x322   : > { %468 = vadd.xlane.f32.xlu1 %v467_v50 }
 0x333   : > { %555 = vrot.lane.b32.xlu1 %v2009_v12, %s1811_s12 }
 0x337   : > { %553 = vrot.lane.b32.xlu1 %v2011_v14, %s1811_s12 }
 0x33b   : > { %549 = vrot.lane.b32.xlu1 %v2011_v14, %s1812_s14 }
 0x33f   : > { %551 = vrot.lane.b32.xlu1 %v2009_v12, %s1812_s14  ;;  %s271_s14 = scalar_lea.vmem [#allocation8], %s1341_s8 }
 0x39f   : > { %v472_v51 = vpop.xlane.xlu1 %471 }
 0x3a3   : > { %v475_v52 = vpop.xlane.xlu1 %474 }
 0x3a4   : > { %1610 = vrcp.f32 %v475_v52 }
 0x3a7   : > { %v466_v53 = vpop.xlane.xlu1 %465 }
 0x3a8   : > { %1612 = vrcp.f32 %v466_v53 }
 0x3a9   : > { %1614 = vrcp.f32 %v472_v51 }
 0x3ab   : > { %v469_v54 = vpop.xlane.xlu1 %468 }
 0x3ac   : > { %1616 = vrcp.f32 %v469_v54 }
 0x3af   : > { %v556_v55 = vpop.permute.xlu1 %555 }
 0x3b0   : > { %1510 = vmatprep.subr.msk.bf16.mxu0 %vm374_vm1, %v556_v55  ;;  %v567_v3 = vsel %vm374_vm1, %v556_v55, 0 }
 0x3b1   : > { %v1611_v56 = vpop.eup %1610 }
 0x3b2   : > { %v483_v61 = vmul.f32 %v1611_v56, %v463_v44 }
 0x3b3   : > { %v554_v60 = vpop.permute.xlu1 %553 }
 0x3b4   : > { %v564_v5 = vsel %vm374_vm1, %v554_v60, 0 }
 0x3b5   : > { %v1613_v57 = vpop.eup %1612 }
 0x3b6   : > { %v1615_v58 = vpop.eup %1614  ;;  %v480_v62 = vmul.f32 %v1613_v57, %v460_v47 }
 0x3b7   : > { %v482_v0 = vmul.f32 %v1615_v58, %v462_v42  ;;  %v550_v4 = vpop.permute.xlu1 %549 }
 0x3b9   : > { %v1617_v59 = vpop.eup %1616  ;;  %v485_v2 = vpack.c.bf16 %v483_v61, %v482_v0 }
 0x3ba   : > { %v481_v63 = vmul.f32 %v1617_v59, %v461_v49 }
 0x3bb   : > { %v552_v6 = vpop.permute.xlu1 %551 }
 0x3bc   : > { %v484_v1 = vpack.c.bf16 %v481_v63, %v480_v62 }
 0x3be   : > { %1448 = vmatprep.mubr.msk.bf16.mxu0 %vm310_vm0, %v484_v1 }
 0x3bf   : > { %1449 = vmatmul.mubr.msk.bf16.vlgmr.msra.gmra.mxu0 %vm310_vm0, %v485_v2 }
 0x3c0   : > { %1453 = vmatpush3.bf16.xpose.msra.mxu0 %v567_v3  ;;  %1456 = vmatprep.mubr.msk.bf16.mxu0 %vm374_vm1, %v550_v4 }
 0x3c1   : > { %1511 = vmatprep.subr.msk.bf16.mxu0 %vm374_vm1, %v554_v60 }
 0x3c8   : > { %1455 = vmatpush3.bf16.xpose.msra.mxu0 %v564_v5 }
 0x3cf   : > { %1457 = vmatmul.mubr.msk.bf16.vlgmr.msra.gmra.mxu0 %vm374_vm1, %v552_v6 }
 0x47f   : > { %v2047_v7 = vpop.f32.mrf.mxu0 }
 0x481   : > { %v2049_v8 = vpop.f32.mrf.mxu0 }
 0x483   : > { %v2051_v9 = vpop.f32.mrf.mxu0 }
 0x484   : > { %v548_v10 = vpack.c.bf16 %v2051_v9, %v2047_v7 }
 0x485   : > { %v2055_v11 = vpop.f32.mrf.mxu0 }
 0x486   : > { %v547_v13 = vpack.c.bf16 %v2055_v11, %v2049_v8  ;;  %v1368_v8 = vld [vmem:[%s2210_s4] ss:$0 sm:$0xff] }
 0x48f   : > { %v1458_v15 = vpop.f32.mrf.mxu0 }
 0x490   : > { %v624_v20 = vsel %vm310_vm0, %v1458_v15, -inf }
 0x491   : > { %v603_v16 = vpop.f32.mrf.mxu0 }
 0x492   : > { %v618_v17 = vsel %vm310_vm0, %v603_v16, -inf }
 0x493   : > { %619 = vmax.xlane.f32.xlu0 %v618_v17  ;;  %v1459_v18 = vpop.f32.mrf.mxu0 }
 0x494   : > { %v627_v22 = vsel %vm310_vm0, %v1459_v18, -inf }
 0x495   : > { %v606_v19 = vpop.f32.mrf.mxu0 }
 0x496   : > { %v621_v21 = vsel %vm310_vm0, %v606_v19, -inf }
 0x497   : > { %625 = vmax.xlane.f32.xlu0 %v624_v20  ;;  %622 = vmax.xlane.f32.xlu1 %v621_v21 }
 0x49b   : > { %628 = vmax.xlane.f32.xlu0 %v627_v22 }
 0x4a8   : > { %670 = vrot.lane.b32.xlu1 %v2009_v12, %s1813_s6 }
 0x51c   : > { %v620_v23 = vpop.xlane.xlu0 %619 }
 0x51d   : > { %v630_v26 = vsub.f32 %v603_v16, %v620_v23 }
 0x520   : > { %v626_v24 = vpop.xlane.xlu0 %625  ;;  %v623_v25 = vpop.xlane.xlu1 %622 }
 0x521   : > { %v631_v27 = vsub.f32 %v606_v19, %v623_v25  ;;  %v632_v31 = vsub.f32 %v1458_v15, %v626_v24 }
 0x523   : > { %v634_v28 = vpack.c.bf16 %v631_v27, %v630_v26 }
 0x524   : > { %v629_v29 = vpop.xlane.xlu0 %628  ;;  %v671_v30 = vpop.permute.xlu1 %670 }
 0x525   : > { %v633_v32 = vsub.f32 %v1459_v18, %v629_v29  ;;  %1460 = vmatprep.subr.bf16.mxu1 %v671_v30  ;;  %v637_v33 = vmul.bf16 1069105081, %v634_v28 }
 0x526   : > { %1461 = vmatpush3.bf16.msra.mxu1 %v671_v30 }
 0x527   : > { %v635_v34 = vpack.c.bf16 %v633_v32, %v632_v31  ;;  %1618 = vpow.bf16 %v637_v33 }
 0x529   : > { %v640_v35 = vmul.bf16 1069105081, %v635_v34 }
 0x52b   : > { %1620 = vpow.bf16 %v640_v35 }
 0x535   : > { %v1619_v36 = vpop.eup %1618 }
 0x536   : > { %v643_v42 = vunpack.c.h.bf16 %v1619_v36  ;;  %v642_v43 = vunpack.c.l.bf16 %v1619_v36 }
 0x538   : > { %v649_v44 = vsel %vm310_vm0, %v643_v42, 0.0  ;;  %v646_v45 = vsel %vm310_vm0, %v642_v43, 0.0 }
 0x539   : > { %v1621_v37 = vpop.eup %1620 }
 0x53a   : > { %v645_v38 = vunpack.c.h.bf16 %v1621_v37  ;;  %v644_v39 = vunpack.c.l.bf16 %v1621_v37 }
 0x53c   : > { %v655_v40 = vsel %vm310_vm0, %v645_v38, 0.0  ;;  %v652_v41 = vsel %vm310_vm0, %v644_v39, 0.0 }
 0x53d   : > { %656 = vadd.xlane.f32.xlu0 %v655_v40  ;;  %653 = vadd.xlane.f32.xlu1 %v652_v41 }
 0x541   : > { %650 = vadd.xlane.f32.xlu0 %v649_v44  ;;  %647 = vadd.xlane.f32.xlu1 %v646_v45 }
 0x552   : > { %737 = vrot.lane.b32.xlu1 %v2009_v12, %s1814_s7 }
 0x556   : > { %735 = vrot.lane.b32.xlu1 %v2011_v14, %s1814_s7  ;;  %s1387_s7 = sshll.u32 %s1876_s22, 8  ;;  %s1227_s22 = scalar_lea.sflag [#allocation4], %s1990_s30 }
 0x557   : > { %668 = vrot.lane.b32.xlu0 %v2011_v14, %s1813_s6  ;;  %s1240_s6 = sshll.u32 %s271_s14, 4  ;;  %s2155_s6 = int_to_ptr.vmem [resolvable:$true] %s1240_s6 }
 0x55a   : > { %733 = vrot.lane.b32.xlu1 %v2009_v12, %s1815_s28 }
 0x55b   : > { %731 = vrot.lane.b32.xlu0 %v2011_v14, %s1815_s28 }
 0x5c6   : > { %v657_v46 = vpop.xlane.xlu0 %656  ;;  %v654_v47 = vpop.xlane.xlu1 %653 }
 0x5c7   : > { %1622 = vrcp.f32 %v657_v46 }
 0x5c8   : > { %1624 = vrcp.f32 %v654_v47 }
 0x5ca   : > { %v651_v48 = vpop.xlane.xlu0 %650  ;;  %v648_v49 = vpop.xlane.xlu1 %647 }
 0x5cb   : > { %1626 = vrcp.f32 %v651_v48 }
 0x5cc   : > { %1628 = vrcp.f32 %v648_v49 }
 0x5ce   : > { %v669_v50 = vpop.permute.xlu0 %668  ;;  %v738_v51 = vpop.permute.xlu1 %737 }
 0x5cf   : > { %1462 = vmatprep.subr.bf16.mxu1 %v669_v50  ;;  %v749_v62 = vsel %vm374_vm1, %v738_v51, 0 }
 0x5d0   : > { %1463 = vmatpush3.bf16.msra.mxu1 %v669_v50 }
 0x5d1   : > { %1512 = vmatprep.subr.msk.bf16.mxu1 %vm374_vm1, %v738_v51 }
 0x5d2   : > { %v732_v63 = vpop.permute.xlu0 %731  ;;  %v736_v0 = vpop.permute.xlu1 %735 }
 0x5d3   : > { %v746_v1 = vsel %vm374_vm1, %v736_v0, 0 }
 0x5d4   : > { %v1623_v52 = vpop.eup %1622 }
 0x5d5   : > { %v1625_v53 = vpop.eup %1624  ;;  %v665_v58 = vmul.f32 %v1623_v52, %v645_v38 }
 0x5d6   : > { %v664_v57 = vmul.f32 %v1625_v53, %v644_v39  ;;  %v734_v2 = vpop.permute.xlu1 %733 }
 0x5d8   : > { %v1627_v54 = vpop.eup %1626  ;;  %v667_v61 = vpack.c.bf16 %v665_v58, %v664_v57 }
 0x5d9   : > { %v1629_v55 = vpop.eup %1628  ;;  %v663_v56 = vmul.f32 %v1627_v54, %v643_v42 }
 0x5da   : > { %v662_v59 = vmul.f32 %v1629_v55, %v642_v43 }
 0x5dc   : > { %v666_v60 = vpack.c.bf16 %v663_v56, %v662_v59 }
 0x5de   : > { %1464 = vmatprep.mubr.msk.bf16.mxu1 %vm310_vm0, %v666_v60 }
 0x5df   : > { %1465 = vmatmul.mubr.msk.bf16.vlgmr.msra.gmra.mxu1 %vm310_vm0, %v667_v61 }
 0x5e0   : > { %1469 = vmatpush3.bf16.xpose.msra.mxu1 %v749_v62  ;;  %1472 = vmatprep.mubr.msk.bf16.mxu1 %vm374_vm1, %v732_v63 }
 0x5e1   : > { %1513 = vmatprep.subr.msk.bf16.mxu1 %vm374_vm1, %v736_v0 }
 0x5e8   : > { %1471 = vmatpush3.bf16.xpose.msra.mxu1 %v746_v1 }
 0x5ef   : > { %1473 = vmatmul.mubr.msk.bf16.vlgmr.msra.gmra.mxu1 %vm374_vm1, %v734_v2 }
 0x69f   : > { %v2083_v3 = vpop.f32.mrf.mxu1 }
 0x6a1   : > { %v2085_v4 = vpop.f32.mrf.mxu1 }
 0x6a3   : > { %v2087_v5 = vpop.f32.mrf.mxu1 }
 0x6a4   : > { %v730_v6 = vpack.c.bf16 %v2087_v5, %v2083_v3 }
 0x6a5   : > { %v2091_v15 = vpop.f32.mrf.mxu1 }
 0x6a6   : > { %v729_v16 = vpack.c.bf16 %v2091_v15, %v2085_v4 }
 0x6af   : > { %v1474_v17 = vpop.f32.mrf.mxu1 }
 0x6b0   : > { %v806_v22 = vsel %vm310_vm0, %v1474_v17, -inf }
 0x6b1   : > { %v785_v18 = vpop.f32.mrf.mxu1 }
 0x6b2   : > { %v800_v19 = vsel %vm310_vm0, %v785_v18, -inf }
 0x6b3   : > { %801 = vmax.xlane.f32.xlu0 %v800_v19  ;;  %v1475_v20 = vpop.f32.mrf.mxu1 }
 0x6b4   : > { %v809_v24 = vsel %vm310_vm0, %v1475_v20, -inf }
 0x6b5   : > { %v788_v21 = vpop.f32.mrf.mxu1 }
 0x6b6   : > { %v803_v23 = vsel %vm310_vm0, %v788_v21, -inf }
 0x6b7   : > { %807 = vmax.xlane.f32.xlu0 %v806_v22  ;;  %804 = vmax.xlane.f32.xlu1 %v803_v23 }
 0x6bb   : > { %810 = vmax.xlane.f32.xlu0 %v809_v24 }
 0x6c8   : > { %852 = vrot.lane.b32.xlu1 %v2009_v12, %s1816_s11 }
 0x73c   : > { %v802_v25 = vpop.xlane.xlu0 %801 }
 0x73d   : > { %v812_v28 = vsub.f32 %v785_v18, %v802_v25 }
 0x740   : > { %v808_v26 = vpop.xlane.xlu0 %807  ;;  %v805_v27 = vpop.xlane.xlu1 %804 }
 0x741   : > { %v813_v29 = vsub.f32 %v788_v21, %v805_v27  ;;  %v814_v33 = vsub.f32 %v1474_v17, %v808_v26 }
 0x743   : > { %v816_v30 = vpack.c.bf16 %v813_v29, %v812_v28 }
 0x744   : > { %v811_v31 = vpop.xlane.xlu0 %810  ;;  %v853_v32 = vpop.permute.xlu1 %852 }
 0x745   : > { %v815_v34 = vsub.f32 %v1475_v20, %v811_v31  ;;  %1476 = vmatprep.subr.bf16.mxu0 %v853_v32  ;;  %v819_v35 = vmul.bf16 1069105081, %v816_v30 }
 0x746   : > { %1477 = vmatpush3.bf16.msra.mxu0 %v853_v32 }
 0x747   : > { %v817_v36 = vpack.c.bf16 %v815_v34, %v814_v33  ;;  %1630 = vpow.bf16 %v819_v35 }
 0x749   : > { %v822_v37 = vmul.bf16 1069105081, %v817_v36 }
 0x74b   : > { %1632 = vpow.bf16 %v822_v37 }
 0x755   : > { %v1631_v38 = vpop.eup %1630 }
 0x756   : > { %v825_v44 = vunpack.c.h.bf16 %v1631_v38  ;;  %v824_v45 = vunpack.c.l.bf16 %v1631_v38 }
 0x758   : > { %v831_v46 = vsel %vm310_vm0, %v825_v44, 0.0  ;;  %v828_v47 = vsel %vm310_vm0, %v824_v45, 0.0 }
 0x759   : > { %v1633_v39 = vpop.eup %1632 }
 0x75a   : > { %v827_v40 = vunpack.c.h.bf16 %v1633_v39  ;;  %v826_v41 = vunpack.c.l.bf16 %v1633_v39 }
 0x75c   : > { %v837_v42 = vsel %vm310_vm0, %v827_v40, 0.0  ;;  %v834_v43 = vsel %vm310_vm0, %v826_v41, 0.0 }
 0x75d   : > { %838 = vadd.xlane.f32.xlu0 %v837_v42  ;;  %835 = vadd.xlane.f32.xlu1 %v834_v43 }
 0x761   : > { %832 = vadd.xlane.f32.xlu0 %v831_v46  ;;  %829 = vadd.xlane.f32.xlu1 %v828_v47 }
 0x772   : > { %919 = vrot.lane.b32.xlu1 %v2009_v12, %s1817_s17 }
 0x776   : > { %917 = vrot.lane.b32.xlu1 %v2011_v14, %s1817_s17  ;;  %s1734_s17 = scalar_lea.vmem %s2155_s6, 256 }
 0x777   : > { %850 = vrot.lane.b32.xlu0 %v2011_v14, %s1816_s11  ;;  %s2161_s11 = scalar_lea.hbm %s2211_s5, %s1387_s7  ;;  %p1735_p3 = scmp.ne.s32.totalorder %s2155_s6, %s1734_s17 }
 0x779   : > { %p1736_p7 = pnand %p1735_p3, %p2228_p2 }
 0x77a   : > { %915 = vrot.lane.b32.xlu1 %v2009_v12, %s1818_s16 }
 0x77b   : > { %913 = vrot.lane.b32.xlu0 %v2011_v14, %s1818_s16  ;;  %p1737_p11 = pneg %p1736_p7  ;;  %s1823_s16 = smov [#allocation8]  }
 0x7e6   : > { %v839_v48 = vpop.xlane.xlu0 %838  ;;  %v836_v49 = vpop.xlane.xlu1 %835 }
 0x7e7   : > { %1634 = vrcp.f32 %v839_v48 }
 0x7e8   : > { %1636 = vrcp.f32 %v836_v49 }
 0x7ea   : > { %v833_v50 = vpop.xlane.xlu0 %832  ;;  %v830_v51 = vpop.xlane.xlu1 %829 }
 0x7eb   : > { %1638 = vrcp.f32 %v833_v50 }
 0x7ec   : > { %1640 = vrcp.f32 %v830_v51 }
 0x7ee   : > { %v851_v52 = vpop.permute.xlu0 %850  ;;  %v920_v53 = vpop.permute.xlu1 %919 }
 0x7ef   : > { %1478 = vmatprep.subr.bf16.mxu0 %v851_v52  ;;  %v931_v0 = vsel %vm374_vm1, %v920_v53, 0 }
 0x7f0   : > { %1479 = vmatpush3.bf16.msra.mxu0 %v851_v52 }
 0x7f1   : > { %1514 = vmatprep.subr.msk.bf16.mxu0 %vm374_vm1, %v920_v53 }
 0x7f2   : > { %v914_v1 = vpop.permute.xlu0 %913  ;;  %v918_v2 = vpop.permute.xlu1 %917 }
 0x7f3   : > { %v928_v17 = vsel %vm374_vm1, %v918_v2, 0 }
 0x7f4   : > { %v1635_v54 = vpop.eup %1634 }
 0x7f5   : > { %v1637_v55 = vpop.eup %1636  ;;  %v847_v60 = vmul.f32 %v1635_v54, %v827_v40 }
 0x7f6   : > { %v846_v59 = vmul.f32 %v1637_v55, %v826_v41  ;;  %v916_v18 = vpop.permute.xlu1 %915 }
 0x7f8   : > { %v1639_v56 = vpop.eup %1638  ;;  %v849_v63 = vpack.c.bf16 %v847_v60, %v846_v59 }
 0x7f9   : > { %v1641_v57 = vpop.eup %1640  ;;  %v845_v58 = vmul.f32 %v1639_v56, %v825_v44 }
 0x7fa   : > { %v844_v61 = vmul.f32 %v1641_v57, %v824_v45 }
 0x7fc   : > { %v848_v62 = vpack.c.bf16 %v845_v58, %v844_v61 }
 0x7fe   : > { %1480 = vmatprep.mubr.msk.bf16.mxu0 %vm310_vm0, %v848_v62 }
 0x7ff   : > { %1481 = vmatmul.mubr.msk.bf16.vlgmr.msra.gmra.mxu0 %vm310_vm0, %v849_v63  ;;  %v1604_v63 = vld [vmem:[#allocation7 + $0x8] sm:$0xff]  }
 0x800   : > { %1485 = vmatpush3.bf16.xpose.msra.mxu0 %v931_v0  ;;  %1488 = vmatprep.mubr.msk.bf16.mxu0 %vm374_vm1, %v914_v1  ;;  %v1605_v0 = vld [vmem:[#allocation7] sm:$0xff]  }
 0x801   : > { %1515 = vmatprep.subr.msk.bf16.mxu0 %vm374_vm1, %v918_v2 }
 0x808   : > { %1487 = vmatpush3.bf16.xpose.msra.mxu0 %v928_v17 }
 0x80f   : > { %1489 = vmatmul.mubr.msk.bf16.vlgmr.msra.gmra.mxu0 %vm374_vm1, %v916_v18 }
 0x8bf   : > { %v1482_v19 = vpop.f32.mrf.mxu0 }
 0x8c1   : > { %v896_v20 = vpop.f32.mrf.mxu0 }
 0x8c3   : > { %v1483_v21 = vpop.f32.mrf.mxu0 }
 0x8c4   : > { %v912_v22 = vpack.c.bf16 %v1483_v21, %v1482_v19 }
 0x8c5   : > { %v899_v23 = vpop.f32.mrf.mxu0 }
 0x8c6   : > { %v911_v24 = vpack.c.bf16 %v899_v23, %v896_v20 }
 0x8cf   : > { %v1490_v25 = vpop.f32.mrf.mxu0 }
 0x8d0   : > { %v988_v30 = vsel %vm310_vm0, %v1490_v25, -inf }
 0x8d1   : > { %v967_v26 = vpop.f32.mrf.mxu0 }
 0x8d2   : > { %v982_v27 = vsel %vm310_vm0, %v967_v26, -inf }
 0x8d3   : > { %983 = vmax.xlane.f32.xlu0 %v982_v27  ;;  %v1491_v28 = vpop.f32.mrf.mxu0 }
 0x8d4   : > { %v991_v32 = vsel %vm310_vm0, %v1491_v28, -inf }
 0x8d5   : > { %v970_v29 = vpop.f32.mrf.mxu0 }
 0x8d6   : > { %v985_v31 = vsel %vm310_vm0, %v970_v29, -inf }
 0x8d7   : > { %989 = vmax.xlane.f32.xlu0 %v988_v30  ;;  %986 = vmax.xlane.f32.xlu1 %v985_v31 }
 0x8db   : > { %992 = vmax.xlane.f32.xlu0 %v991_v32 }
 0x95c   : > { %v984_v33 = vpop.xlane.xlu0 %983 }
 0x95d   : > { %v994_v36 = vsub.f32 %v967_v26, %v984_v33 }
 0x960   : > { %v990_v34 = vpop.xlane.xlu0 %989  ;;  %v987_v35 = vpop.xlane.xlu1 %986 }
 0x961   : > { %v995_v37 = vsub.f32 %v970_v29, %v987_v35  ;;  %v996_v40 = vsub.f32 %v1490_v25, %v990_v34 }
 0x963   : > { %v998_v38 = vpack.c.bf16 %v995_v37, %v994_v36 }
 0x964   : > { %v993_v39 = vpop.xlane.xlu0 %992 }
 0x965   : > { %v997_v41 = vsub.f32 %v1491_v28, %v993_v39  ;;  %v1001_v42 = vmul.bf16 1069105081, %v998_v38 }
 0x967   : > { %v999_v43 = vpack.c.bf16 %v997_v41, %v996_v40  ;;  %1642 = vpow.bf16 %v1001_v42 }
 0x969   : > { %v1004_v44 = vmul.bf16 1069105081, %v999_v43 }
 0x96b   : > { %1644 = vpow.bf16 %v1004_v44 }
 0x975   : > { %v1643_v45 = vpop.eup %1642 }
 0x976   : > { %v1007_v51 = vunpack.c.h.bf16 %v1643_v45  ;;  %v1006_v52 = vunpack.c.l.bf16 %v1643_v45 }
 0x978   : > { %v1013_v53 = vsel %vm310_vm0, %v1007_v51, 0.0  ;;  %v1010_v54 = vsel %vm310_vm0, %v1006_v52, 0.0 }
 0x979   : > { %v1645_v46 = vpop.eup %1644 }
 0x97a   : > { %v1009_v47 = vunpack.c.h.bf16 %v1645_v46  ;;  %v1008_v48 = vunpack.c.l.bf16 %v1645_v46 }
 0x97c   : > { %v1019_v49 = vsel %vm310_vm0, %v1009_v47, 0.0  ;;  %v1016_v50 = vsel %vm310_vm0, %v1008_v48, 0.0 }
 0x97d   : > { %1020 = vadd.xlane.f32.xlu0 %v1019_v49  ;;  %1017 = vadd.xlane.f32.xlu1 %v1016_v50 }
 0x981   : > { %1014 = vadd.xlane.f32.xlu0 %v1013_v53  ;;  %1011 = vadd.xlane.f32.xlu1 %v1010_v54 }
 0x992   : > { %1034 = vrot.lane.b32.xlu1 %v2009_v12, %s1819_s29 }
 0x996   : > { %1097 = vrot.lane.b32.xlu1 %v729_v16, %s1820_s13 }
 0x997   : > { %1032 = vrot.lane.b32.xlu0 %v2011_v14, %s1819_s29  ;;  %s1738_s29 = sshll.u32 %s1823_s16, 4  ;;  %s1739_s29 = int_to_ptr.vmem [resolvable:$false] %s1738_s29 }
 0x998   : > { %p1741_p12 = scmp.lt.s32.totalorder %s2155_s6, %s1739_s29 }
 0x99a   : > { %1099 = vrot.lane.b32.xlu1 %v730_v6, %s1820_s13  ;;  %s1740_s13 = scalar_lea.vmem %s1739_s29, 512 }
 0x99b   : > { %1103 = vrot.lane.b32.xlu0 %v911_v24, %s1821_s24  ;;  %p1742_p13 = scmp.lt.s32.totalorder %s1740_s13, %s1734_s17 }
 0x99d   : > { %p1743_p0 = por %p1742_p13, %p1741_p12 }
 0x99e   : > { %1105 = vrot.lane.b32.xlu1 %v912_v22, %s1821_s24 }
 0x99f   : > { %p1744_p5 = pnand %p1743_p0, %p1737_p11 }
 0xa06   : > { %v1021_v55 = vpop.xlane.xlu0 %1020  ;;  %v1018_v56 = vpop.xlane.xlu1 %1017 }
 0xa07   : > { %1646 = vrcp.f32 %v1021_v55 }
 0xa08   : > { %1648 = vrcp.f32 %v1018_v56 }
 0xa0a   : > { %v1015_v57 = vpop.xlane.xlu0 %1014  ;;  %v1012_v12 = vpop.xlane.xlu1 %1011 }
 0xa0b   : > { %1650 = vrcp.f32 %v1015_v57 }
 0xa0c   : > { %1652 = vrcp.f32 %v1012_v12 }
 0xa0e   : > { %v1035_v58 = vpop.permute.xlu1 %1034  ;;  %v1033_v4 = vpop.permute.xlu0 %1032 }
 0xa0f   : > { %1492 = vmatprep.subr.bf16.mxu1 %v1035_v58 }
 0xa10   : > { %1493 = vmatpush3.bf16.msra.mxu1 %v1035_v58 }
 0xa11   : > { %1494 = vmatprep.subr.bf16.mxu1 %v1033_v4 }
 0xa12   : > { %v1098_v21 = vpop.permute.xlu1 %1097  ;;  %v1104_v24 = vpop.permute.xlu0 %1103 }
 0xa13   : > { %v1115_v25 = vsel %vm374_vm1, %v547_v13, %v1098_v21 }
 0xa14   : > { %1495 = vmatpush3.bf16.msra.mxu1 %v1033_v4  ;;  %v1647_v14 = vpop.eup %1646  ;;  %v1121_v29 = vsel %vm1119_vm2, %v1115_v25, %v1104_v24 }
 0xa15   : > { %v1649_v3 = vpop.eup %1648  ;;  %v1029_v59 = vmul.f32 %v1647_v14, %v1009_v47  ;;  %1500 = vmatprep.subr.bf16.mxu1 %v1604_v63 }
 0xa16   : > { %v1028_v16 = vmul.f32 %v1649_v3, %v1008_v48  ;;  %v1100_v22 = vpop.permute.xlu1 %1099 }
 0xa17   : > { %v1118_v27 = vsel %vm374_vm1, %v548_v10, %v1100_v22 }
 0xa18   : > { %v1651_v5 = vpop.eup %1650  ;;  %v1031_v62 = vpack.c.bf16 %v1029_v59, %v1028_v16 }
 0xa19   : > { %v1653_v6 = vpop.eup %1652  ;;  %v1027_v15 = vmul.f32 %v1651_v5, %v1007_v51 }
 0xa1a   : > { %v1026_v60 = vmul.f32 %v1653_v6, %v1006_v52  ;;  %v1106_v23 = vpop.permute.xlu1 %1105 }
 0xa1b   : > { %v1123_v30 = vsel %vm1119_vm2, %v1118_v27, %v1106_v23 }
 0xa1c   : > { %v1030_v61 = vpack.c.bf16 %v1027_v15, %v1026_v60 }
 0xa1e   : > { %1496 = vmatprep.mubr.msk.bf16.mxu1 %vm310_vm0, %v1030_v61 }
 0xa1f   : > { %1497 = vmatmul.mubr.msk.bf16.vlgmr.msra.gmra.mxu1 %vm310_vm0, %v1031_v62 }
 0xa20   : > { %1501 = vmatpush3.bf16.msra.mxu1 %v1604_v63 }
 0xa21   : > { %1502 = vmatprep.subr.bf16.mxu1 %v1605_v0 }
 0xa24   : > { %1503 = vmatpush3.bf16.msra.mxu1 %v1605_v0 }
 0xadf   : > { %v1498_v1 = vpop.f32.mrf.mxu1 }
 0xae1   : > { %v1078_v2 = vpop.f32.mrf.mxu1 }
 0xae3   : > { %v1499_v17 = vpop.f32.mrf.mxu1 }
 0xae4   : > { %v1094_v18 = vpack.c.bf16 %v1499_v17, %v1498_v1 }
 0xae5   : > { %v1081_v19 = vpop.f32.mrf.mxu1 }
 0xae6   : > { %v1093_v20 = vpack.c.bf16 %v1081_v19, %v1078_v2  ;;  %1111 = vrot.lane.b32.xlu1 %v1094_v18, %s1822_s26 }
 0xae8   : > { %1109 = vrot.lane.b32.xlu0 %v1093_v20, %s1822_s26 }
 0xb58   : > { %v1112_v26 = vpop.permute.xlu1 %1111 }
 0xb59   : > { %v1128_v32 = vsel %vm1124_vm3, %v1123_v30, %v1112_v26 }
 0xb5a   : > { %v1110_v28 = vpop.permute.xlu0 %1109 }
 0xb5b   : > { %v1126_v31 = vsel %vm1124_vm3, %v1121_v29, %v1110_v28 }
 0xb5c   : > { %1504 = vmatprep.mubr.msk.bf16.mxu1 %vm310_vm0, %v1126_v31 }
 0xb5d   : > { %1505 = vmatmul.mubr.msk.bf16.vlgmr.msra.gmra.mxu1 %vm310_vm0, %v1128_v32 }
 0xc1d   : > { %v1506_v11 = vpop.f32.mrf.mxu1 }
 0xc1e   : > { %v1199_v13 = vadd.f32 %v1506_v11, %v1368_v8 }
 0xc1f   : > { %v1190_v7 = vpop.f32.mrf.mxu1 }
 0xc20   : > { %v1385_v9 = vpack.c.bf16 %v1199_v13, %v1199_v13  ;;  %v1191_v10 = vadd.f32 %v1368_v8, %v1190_v7 }
 0xc21   : > { %v1507_v33 = vpop.f32.mrf.mxu1 }
 0xc22   : > { %1224 = vst.msk [vmem:[%s271_s14 + $0x8] sm:$0xf] %vm1221_vm4, %v1385_v9  ;;  %v1383_v34 = vpack.c.bf16 %v1191_v10, %v1191_v10  ;;  %v1202_v35 = vadd.f32 %v1507_v33, %v1368_v8 }
 0xc23   : > { %v1193_v36 = vpop.f32.mrf.mxu1 }
 0xc24   : > { %1222 = vst.msk [vmem:[%s271_s14] sm:$0xf] %vm1221_vm4, %v1383_v34  ;;  %v1386_v37 = vpack.c.bf16 %v1202_v35, %v1202_v35  ;;  %v1194_v38 = vadd.f32 %v1368_v8, %v1193_v36 }
 0xc26   : > { %1225 = vst.msk [vmem:[%s271_s14 + $0xc] sm:$0xf] %vm1221_vm4, %v1386_v37  ;;  %v1384_v39 = vpack.c.bf16 %v1194_v38, %v1194_v38 }
 0xc28   : > { %1223 = vst.msk [vmem:[%s271_s14 + $0x4] sm:$0xf] %vm1221_vm4, %v1384_v39 }
 0xc29   : > { %1747 = shalt.err (!%p1744_p5)
}
 0xc2a   : > { %s1748_s24 = scalar_lea.hbm %s2161_s11, 256  ;;  %s1752_s12 = scalar_lea.hbm %s2211_s5, 2048 }
 0xc2b   : > { %p1749_p10 = scmp.ne.s32.totalorder %s2161_s11, %s1748_s24  ;;  %p1753_p4 = scmp.lt.s32.totalorder %s2161_s11, %s2211_s5 }
 0xc2c   : > { %p1754_p6 = scmp.lt.s32.totalorder %s1752_s12, %s1748_s24 }
 0xc2d   : > { %p1750_p9 = pnand %p1749_p10, %p2228_p2 }
 0xc2e   : > { %p1755_p8 = por %p1754_p6, %p1753_p4 }
 0xc2f   : > { %p1751_p1 = pneg %p1750_p9 }
 0xc31   : > { %p1756_p3 = pnand %p1755_p8, %p1751_p1 }
 0xc33   : > { %1759 = shalt.err (!%p1756_p3)
}
 0xc34   : > { %s1824_s8 = smov 4  }
 0xc35   : > { %1526 = dma.vmem_to_hbm [thread:$0]  (%p2228_p2), %s2155_s6, 256, %s2161_s11, %s1227_s22, %s1810_s10, %s1810_s10, %s1824_s8  }
 0xc36 PF: > { %p1548_p7 = scmp.ge.s32.totalorder %s1802_s21, 2  ;;  %s1255_s28 = sand.u32 1, %s1790_s18  }
 0xc37   : > { %p2229_p11 = scmp.ne.s32.totalorder %s2218_s25, 0  ;;  %s1256_s17 = scalar_lea.sflag [#allocation4], %s1255_s28 }
 0xc39   : > { %p1540_p12 = pnand %p1548_p7, %p2229_p11 }
 0xc3b   : > { %p1541_p13 = pneg %p1540_p12 }
 0xc3d   : > { %1785 = dma.done.wait (%p1541_p13), %s1256_s17, 256  }
 0xc3e   : > { %1787 = vsyncadd (%p1541_p13), %s1256_s17, 4294967040  ;;  %p19_p0 = scmp.ge.s32.totalorder %s1932_s15, 10   ;;  %s2230_s18 = smov %s1794_s19 }
 0xc3f   : > { %s2231_s19 = smov %s1798_s20  ;;  %s2232_s20 = smov %s1948_s27 }
 0xc40   : > { %s2233_s21 = smov %s1932_s15  ;;  %21 = sbr.rel (!%p19_p0) target bundleno = 6 (0x6), region = 93 }
 0xc45   :  { %1261 = vsyncpa [#allocation3], 1 }
 0xc46   :  { %1263 = vsyncpa [#allocation3 + $0x1], 1 }
 0xc47   :  { %1264 = vsyncpa [#allocation6], 1 }
 0xc48   :  { %1265 = vsyncpa [#allocation4], 1 }
 0xc49   :  { %1267 = vsyncpa [#allocation4 + $0x1], 1 }

</bundles_post_ra>
